<compile_context>
chip_gen: v7x
topology: tpu7x:2x2x1
jax: 0.10.0
libtpu: 0.0.40
codegen_flags: <defaults>
</compile_context>

<pallas_src>
import numpy as np

import jax
import jax.numpy as jnp
from jax import lax
from jax.experimental import pallas as pl
from jax.experimental.pallas import tpu as pltpu


PAD = 8  # aligned zero-pad rows above/below every activation slab


# --------------------------------------------------------------------------
# One-time host-side weight-layout preparation
# --------------------------------------------------------------------------

def _fold_conv_weights(w_oihw, w_in, w_out, stride, pad):
    """Fold width gather + conv weights into one (kh*w_in*cin, w_out*cout) matrix.

    v lanes are ordered (kernel_row i, input col w, input chan c); output lanes
    are (out col o, out chan d):
        CW[(i, w, c), (o, d)] = W[d, c, i, j]  where  w = stride*o + j - pad
    (zero when j falls outside the 4-wide kernel -> width zero-padding).
    """
    w_oihw = np.asarray(w_oihw, np.float32)
    cout, cin, kh, kw = w_oihw.shape
    sel = np.zeros((kw, w_in, w_out), np.float32)
    for j in range(kw):
        for o in range(w_out):
            wi = stride * o + j - pad
            if 0 <= wi < w_in:
                sel[j, wi, o] = 1.0
    cw = np.einsum('jwo,dcij->iwcod', sel, w_oihw)
    return jnp.asarray(cw.reshape(kh * w_in * cin, w_out * cout))


def _channel_fold(w_out, cout):
    """0/1 (w_out*cout, cout) matrix summing the w_out lane-groups per channel."""
    e = np.zeros((w_out * cout, cout), np.float32)
    for o in range(w_out):
        for c in range(cout):
            e[o * cout + c, c] = 1.0
    return jnp.asarray(e)


# --------------------------------------------------------------------------
# The single fused Pallas kernel
# --------------------------------------------------------------------------

def _make_kernel(layer_meta, n_consts, neg_slope, bn_eps):
    n_layers = len(layer_meta)

    def kernel(*refs):
        x_ref = refs[0]
        const_refs = refs[1:1 + n_consts]
        out_ref = refs[1 + n_consts]
        act_refs = refs[2 + n_consts:]          # padded VMEM slabs, one per intermediate

        # Zero the scratch slabs once (pad rows around each activation stay 0).
        for a in act_refs:
            a[...] = jnp.zeros_like(a)

        src = x_ref
        ci = 0
        for li, m in enumerate(layer_meta):
            cw_ref = const_refs[ci]
            ci += 1
            rows, h_out, w_out, wc_in = m['rows'], m['h_out'], m['w_out'], m['wc_in']

            if m['stride'] == 2:
                # Height gather: for flattened output row r = b*h_out + o, kernel row i
                # reads input row 2*r + i - 1 (batch-uniform since h_in == 2*h_out).
                # Data lives at slab rows [PAD, PAD + rows_in); offsets stay in-bounds.
                g = [src[pl.ds(PAD - 1 + i, rows, stride=2), :] for i in range(4)]
                # Rows that cross a sample boundary are the conv's zero padding.
                pos = lax.broadcasted_iota(jnp.int32, (rows, wc_in), 0) & (h_out - 1)
                g[0] = jnp.where(pos == 0, 0.0, g[0])
                g[3] = jnp.where(pos == h_out - 1, 0.0, g[3])
            else:
                # Final 4x4 valid conv: grab each sample's 4 rows (stride = h_in = 4).
                g = [src[pl.ds(PAD + i, rows, stride=4), :] for i in range(4)]

            v = jnp.concatenate(g, axis=1)       # (rows, 4*W*Cin) -> K = 256
            acc = jnp.dot(v, cw_ref[...], preferred_element_type=jnp.float32)

            if m['bn']:
                efold_ref = const_refs[ci]
                gamma_ref = const_refs[ci + 1]
                beta_ref = const_refs[ci + 2]
                ci += 3
                inv_n = m['inv_count']
                # Single-pass batch statistics (sum + sum of squares).
                s1 = jnp.sum(acc, axis=0, keepdims=True)
                s2 = jnp.sum(acc * acc, axis=0, keepdims=True)
                mean = jnp.dot(s1, efold_ref[...],
                               preferred_element_type=jnp.float32) * inv_n
                ex2 = jnp.dot(s2, efold_ref[...],
                              preferred_element_type=jnp.float32) * inv_n
                var = ex2 - mean * mean
                scale = gamma_ref[...] * lax.rsqrt(var + bn_eps)
                shift = beta_ref[...] - mean * scale
                # lanes are (o, c): per-channel broadcast is a pure lane tile (VPU).
                acc = acc * jnp.tile(scale, (1, w_out)) + jnp.tile(shift, (1, w_out))

            if m['lrelu']:
                acc = jnp.where(acc >= 0, acc, neg_slope * acc)

            if li < n_layers - 1:
                act_refs[li][pl.ds(PAD, rows), :] = acc
                src = act_refs[li]
            else:
                out_ref[...] = acc               # (B, out_channels)

    return kernel


# --------------------------------------------------------------------------
# Builder
# --------------------------------------------------------------------------

def build_forward(params, *, in_size, in_channels, mid_channels, out_channels,
                  batch, neg_slope=0.2, bn_eps=1e-5):
    n_mid = int(np.log2(in_size)) - 3
    assert n_mid == len(params['mid'])

    consts, layer_meta, act_shapes = [], [], []
    h, c = in_size, in_channels

    # ---- layer 0: Conv(in->mid, k4 s2 p1, bias=False) + LeakyReLU(0.2)
    h_out, c_out = h // 2, mid_channels
    assert h_out & (h_out - 1) == 0
    consts.append(_fold_conv_weights(params['conv0'], h, h_out, 2, 1))
    layer_meta.append(dict(stride=2, rows=batch * h_out, h_out=h_out, w_out=h_out,
                           wc_in=h * c, bn=False, lrelu=True))
    act_shapes.append((PAD + batch * h_out + PAD, h_out * c_out))
    h, c = h_out, c_out

    # ---- mid layers: Conv(k4 s2 p1) + BatchNorm2d(batch stats) + LeakyReLU(0.2)
    for (w, gamma, beta) in params['mid']:
        h_out, c_out = h // 2, c * 2
        assert h_out & (h_out - 1) == 0
        consts += [_fold_conv_weights(w, h, h_out, 2, 1),
                   _channel_fold(h_out, c_out),
                   jnp.asarray(gamma, jnp.float32).reshape(1, c_out),
                   jnp.asarray(beta, jnp.float32).reshape(1, c_out)]
        layer_meta.append(dict(stride=2, rows=batch * h_out, h_out=h_out, w_out=h_out,
                               wc_in=h * c, bn=True, lrelu=True,
                               inv_count=1.0 / float(batch * h_out * h_out)))
        act_shapes.append((PAD + batch * h_out + PAD, h_out * c_out))
        h, c = h_out, c_out

    # ---- final layer: Conv(-> out_channels, k4 s1 p0, bias=False) == dense layer
    assert h == 4
    consts.append(_fold_conv_weights(params['conv_last'], h, 1, 1, 0))
    layer_meta.append(dict(stride=1, rows=batch, h_out=1, w_out=1,
                           wc_in=h * c, bn=False, lrelu=False))
    # TODO(synk): the module's optional trailing `activation=<name>` kwarg is not
    # instantiated in this configuration (defaults to no activation).

    n_consts = len(consts)
    kernel = _make_kernel(layer_meta, n_consts, neg_slope, bn_eps)
    vmem = pltpu.MemorySpace.VMEM
    call = pl.pallas_call(
        kernel,
        out_shape=jax.ShapeDtypeStruct((batch, out_channels), jnp.float32),
        in_specs=[pl.BlockSpec(memory_space=vmem)] * (1 + n_consts),
        out_specs=pl.BlockSpec(memory_space=vmem),
        scratch_shapes=[pltpu.VMEM(s, jnp.float32) for s in act_shapes],
        compiler_params=pltpu.CompilerParams(vmem_limit_bytes=32 * 1024 * 1024),
    )

    def forward(x_nchw):
        # NCHW -> rows = (batch, height), lanes = (width, channels), plus PAD
        # aligned zero rows above/below so every kernel-row height gather is a
        # plain in-bounds strided sublane read inside the kernel.
        x2d = jnp.transpose(x_nchw, (0, 2, 3, 1)).astype(jnp.float32)
        x2d = x2d.reshape(batch * in_size, in_size * in_channels)
        x_pad = jnp.pad(x2d, ((PAD, PAD), (0, 0)))
        return call(x_pad, *consts)

    return forward


# --------------------------------------------------------------------------
# Pure-JAX reference (correctness check)
# --------------------------------------------------------------------------

def _lrelu(x, a=0.2):
    return jnp.where(x >= 0, x, a * x)


def ref_forward(x, params, *, bn_eps=1e-5):
    dn = ('NCHW', 'OIHW', 'NCHW')
    y = lax.conv_general_dilated(x, params['conv0'], (2, 2), [(1, 1), (1, 1)],
                                 dimension_numbers=dn)
    y = _lrelu(y)
    for w, gamma, beta in params['mid']:
        y = lax.conv_general_dilated(y, w, (2, 2), [(1, 1), (1, 1)],
                                     dimension_numbers=dn)
        mean = jnp.mean(y, axis=(0, 2, 3), keepdims=True)
        var = jnp.mean(jnp.square(y - mean), axis=(0, 2, 3), keepdims=True)
        y = (y - mean) * lax.rsqrt(var + bn_eps)
        y = y * gamma[None, :, None, None] + beta[None, :, None, None]
        y = _lrelu(y)
    y = lax.conv_general_dilated(y, params['conv_last'], (1, 1),
                                 [(0, 0), (0, 0)], dimension_numbers=dn)
    return y.reshape(y.shape[0], -1)


# --------------------------------------------------------------------------
# main
# --------------------------------------------------------------------------

if __name__ == "__main__":
    in_size, in_channels, mid_channels, out_channels = 16, 4, 8, 1
    batch = 2
    n_mid_layers = int(np.log2(in_size)) - 3    # = 1

    key = jax.random.PRNGKey(0)
    k_x, k0, k_last, *k_mid = jax.random.split(key, 3 + n_mid_layers)

    params = {
        "conv0": 0.05 * jax.random.normal(
            k0, (mid_channels, in_channels, 4, 4), jnp.float32),
        "mid": [],
        "conv_last": None,
    }
    for i in range(1, n_mid_layers + 1):
        cin = mid_channels * 2 ** (i - 1)
        cout = mid_channels * 2 ** i
        w = 0.05 * jax.random.normal(k_mid[i - 1], (cout, cin, 4, 4), jnp.float32)
        gamma = jnp.ones((cout,), jnp.float32)   # PyTorch BatchNorm2d init
        beta = jnp.zeros((cout,), jnp.float32)
        params["mid"].append((w, gamma, beta))
    params["conv_last"] = 0.05 * jax.random.normal(
        k_last, (out_channels, mid_channels * 2 ** n_mid_layers, 4, 4),
        jnp.float32)

    x = jax.random.normal(k_x, (batch, in_channels, in_size, in_size),
                          jnp.float32)

    forward = jax.jit(build_forward(
        params, in_size=in_size, in_channels=in_channels,
        mid_channels=mid_channels, out_channels=out_channels, batch=batch))

    out = jax.block_until_ready(forward(x))
    ref = jax.block_until_ready(ref_forward(x, params))

    assert out.shape == (batch, out_channels), out.shape
    max_err = float(jnp.max(jnp.abs(out - ref)))
    assert jnp.allclose(out, ref, rtol=2e-4, atol=2e-4), \
        f"max abs err {max_err}"

    print("KERNEL_OK")
</pallas_src>

<mosaic_0001>
module attributes {stable_mosaic.version = 11 : i64} {
  func.func @kernel(%arg0: memref<48x64xf32, #tpu.memory_space<vmem>>, %arg1: memref<256x64xf32, #tpu.memory_space<vmem>>, %arg2: memref<256x64xf32, #tpu.memory_space<vmem>>, %arg3: memref<64x16xf32, #tpu.memory_space<vmem>>, %arg4: memref<1x16xf32, #tpu.memory_space<vmem>>, %arg5: memref<1x16xf32, #tpu.memory_space<vmem>>, %arg6: memref<256x1xf32, #tpu.memory_space<vmem>>, %arg7: memref<2x1xf32, #tpu.memory_space<vmem>>, %arg8: memref<32x64xf32, #tpu.memory_space<vmem>>, %arg9: memref<24x64xf32, #tpu.memory_space<vmem>>) attributes {dimension_semantics = [], scalar_prefetch = 0 : i64, scratch_operands = 2 : i64, tpu.core_type = #tpu.core_type<tc>} {
    %cst = arith.constant 0.000000e+00 : f32
    %0 = vector.broadcast %cst : f32 to vector<32x64xf32>
    %c0 = arith.constant 0 : index
    %c0_0 = arith.constant 0 : index
    %1 = vector.load %arg8[%c0, %c0_0] : memref<32x64xf32, #tpu.memory_space<vmem>>, vector<32x64xf32>
    tpu.vector_store %arg8[%c0, %c0_0], %0 {strides = array<i32>} : memref<32x64xf32, #tpu.memory_space<vmem>>, vector<32x64xf32>,
    %cst_1 = arith.constant 0.000000e+00 : f32
    %2 = vector.broadcast %cst_1 : f32 to vector<24x64xf32>
    %c0_2 = arith.constant 0 : index
    %c0_3 = arith.constant 0 : index
    %3 = vector.load %arg9[%c0_2, %c0_3] : memref<24x64xf32, #tpu.memory_space<vmem>>, vector<24x64xf32>
    tpu.vector_store %arg9[%c0_2, %c0_3], %2 {strides = array<i32>} : memref<24x64xf32, #tpu.memory_space<vmem>>, vector<24x64xf32>,
    %c7 = arith.constant 7 : index
    %c0_4 = arith.constant 0 : index
    %4 = tpu.strided_load %arg0[%c7, %c0_4] {strides = array<i32: 2, 1>} : memref<48x64xf32, #tpu.memory_space<vmem>>, vector<16x64xf32>
    %c8 = arith.constant 8 : index
    %c0_5 = arith.constant 0 : index
    %5 = tpu.strided_load %arg0[%c8, %c0_5] {strides = array<i32: 2, 1>} : memref<48x64xf32, #tpu.memory_space<vmem>>, vector<16x64xf32>
    %c9 = arith.constant 9 : index
    %c0_6 = arith.constant 0 : index
    %6 = tpu.strided_load %arg0[%c9, %c0_6] {strides = array<i32: 2, 1>} : memref<48x64xf32, #tpu.memory_space<vmem>>, vector<16x64xf32>
    %c10 = arith.constant 10 : index
    %c0_7 = arith.constant 0 : index
    %7 = tpu.strided_load %arg0[%c10, %c0_7] {strides = array<i32: 2, 1>} : memref<48x64xf32, #tpu.memory_space<vmem>>, vector<16x64xf32>
    %8 = tpu.iota {dimensions = array<i32: 0>} : vector<16x64xi32>
    %c7_i32 = arith.constant 7 : i32
    %9 = vector.broadcast %c7_i32 : i32 to vector<16x64xi32>
    %10 = arith.andi %8, %9 : vector<16x64xi32>
    %c0_i32 = arith.constant 0 : i32
    %11 = vector.broadcast %c0_i32 : i32 to vector<16x64xi32>
    %12 = arith.cmpi eq, %10, %11 : vector<16x64xi32>
    %cst_8 = arith.constant 0.000000e+00 : f32
    %13 = vector.broadcast %cst_8 : f32 to vector<16x64xf32>
    %14 = arith.select %12, %13, %4 : vector<16x64xi1>, vector<16x64xf32>
    %c7_i32_9 = arith.constant 7 : i32
    %15 = vector.broadcast %c7_i32_9 : i32 to vector<16x64xi32>
    %16 = arith.cmpi eq, %10, %15 : vector<16x64xi32>
    %cst_10 = arith.constant 0.000000e+00 : f32
    %17 = vector.broadcast %cst_10 : f32 to vector<16x64xf32>
    %18 = arith.select %16, %17, %7 : vector<16x64xi1>, vector<16x64xf32>
    %19 = tpu.concatenate %14, %5, %6, %18 in 1 : vector<16x64xf32>, vector<16x64xf32>, vector<16x64xf32>, vector<16x64xf32> -> vector<16x256xf32>
    %c0_11 = arith.constant 0 : index
    %c0_12 = arith.constant 0 : index
    %20 = vector.load %arg1[%c0_11, %c0_12] : memref<256x64xf32, #tpu.memory_space<vmem>>, vector<256x64xf32>
    %cst_13 = arith.constant dense<0.000000e+00> : vector<16x64xf32>
    %21 = tpu.matmul %19, %20, %cst_13 {dimension_numbers = #tpu.dot_dimension_numbers<[1], [0], [0], [1], [0, 0, 1, 1], [], []>} : vector<16x256xf32>, vector<256x64xf32>, vector<16x64xf32> -> vector<16x64xf32>
    %cst_14 = arith.constant 0.000000e+00 : f32
    %22 = vector.broadcast %cst_14 : f32 to vector<16x64xf32>
    %23 = arith.cmpf oge, %21, %22 : vector<16x64xf32>
    %cst_15 = arith.constant 2.000000e-01 : f32
    %24 = vector.broadcast %cst_15 : f32 to vector<16x64xf32>
    %25 = arith.mulf %24, %21 : vector<16x64xf32>
    %26 = arith.select %23, %21, %25 : vector<16x64xi1>, vector<16x64xf32>
    %c8_16 = arith.constant 8 : index
    %c0_17 = arith.constant 0 : index
    %27 = vector.load %arg8[%c8_16, %c0_17] : memref<32x64xf32, #tpu.memory_space<vmem>>, vector<16x64xf32>
    tpu.vector_store %arg8[%c8_16, %c0_17], %26 {strides = array<i32>} : memref<32x64xf32, #tpu.memory_space<vmem>>, vector<16x64xf32>,
    %c7_18 = arith.constant 7 : index
    %c0_19 = arith.constant 0 : index
    %28 = tpu.strided_load %arg8[%c7_18, %c0_19] {strides = array<i32: 2, 1>} : memref<32x64xf32, #tpu.memory_space<vmem>>, vector<8x64xf32>
    %c8_20 = arith.constant 8 : index
    %c0_21 = arith.constant 0 : index
    %29 = tpu.strided_load %arg8[%c8_20, %c0_21] {strides = array<i32: 2, 1>} : memref<32x64xf32, #tpu.memory_space<vmem>>, vector<8x64xf32>
    %c9_22 = arith.constant 9 : index
    %c0_23 = arith.constant 0 : index
    %30 = tpu.strided_load %arg8[%c9_22, %c0_23] {strides = array<i32: 2, 1>} : memref<32x64xf32, #tpu.memory_space<vmem>>, vector<8x64xf32>
    %c10_24 = arith.constant 10 : index
    %c0_25 = arith.constant 0 : index
    %31 = tpu.strided_load %arg8[%c10_24, %c0_25] {strides = array<i32: 2, 1>} : memref<32x64xf32, #tpu.memory_space<vmem>>, vector<8x64xf32>
    %32 = tpu.iota {dimensions = array<i32: 0>} : vector<8x64xi32>
    %c3_i32 = arith.constant 3 : i32
    %33 = vector.broadcast %c3_i32 : i32 to vector<8x64xi32>
    %34 = arith.andi %32, %33 : vector<8x64xi32>
    %c0_i32_26 = arith.constant 0 : i32
    %35 = vector.broadcast %c0_i32_26 : i32 to vector<8x64xi32>
    %36 = arith.cmpi eq, %34, %35 : vector<8x64xi32>
    %cst_27 = arith.constant 0.000000e+00 : f32
    %37 = vector.broadcast %cst_27 : f32 to vector<8x64xf32>
    %38 = arith.select %36, %37, %28 : vector<8x64xi1>, vector<8x64xf32>
    %c3_i32_28 = arith.constant 3 : i32
    %39 = vector.broadcast %c3_i32_28 : i32 to vector<8x64xi32>
    %40 = arith.cmpi eq, %34, %39 : vector<8x64xi32>
    %cst_29 = arith.constant 0.000000e+00 : f32
    %41 = vector.broadcast %cst_29 : f32 to vector<8x64xf32>
    %42 = arith.select %40, %41, %31 : vector<8x64xi1>, vector<8x64xf32>
    %43 = tpu.concatenate %38, %29, %30, %42 in 1 : vector<8x64xf32>, vector<8x64xf32>, vector<8x64xf32>, vector<8x64xf32> -> vector<8x256xf32>
    %c0_30 = arith.constant 0 : index
    %c0_31 = arith.constant 0 : index
    %44 = vector.load %arg2[%c0_30, %c0_31] : memref<256x64xf32, #tpu.memory_space<vmem>>, vector<256x64xf32>
    %cst_32 = arith.constant dense<0.000000e+00> : vector<8x64xf32>
    %45 = tpu.matmul %43, %44, %cst_32 {dimension_numbers = #tpu.dot_dimension_numbers<[1], [0], [0], [1], [0, 0, 1, 1], [], []>} : vector<8x256xf32>, vector<256x64xf32>, vector<8x64xf32> -> vector<8x64xf32>
    %cst_33 = arith.constant dense<0.000000e+00> : vector<64xf32>
    %46 = vector.multi_reduction <add>, %45, %cst_33 [0] : vector<8x64xf32> to vector<64xf32>
    %47 = vector.shape_cast %46 : vector<64xf32> to vector<1x64xf32>
    %48 = arith.mulf %45, %45 : vector<8x64xf32>
    %cst_34 = arith.constant dense<0.000000e+00> : vector<64xf32>
    %49 = vector.multi_reduction <add>, %48, %cst_34 [0] : vector<8x64xf32> to vector<64xf32>
    %50 = vector.shape_cast %49 : vector<64xf32> to vector<1x64xf32>
    %c0_35 = arith.constant 0 : index
    %c0_36 = arith.constant 0 : index
    %51 = vector.load %arg3[%c0_35, %c0_36] : memref<64x16xf32, #tpu.memory_space<vmem>>, vector<64x16xf32>
    %cst_37 = arith.constant dense<0.000000e+00> : vector<1x16xf32>
    %52 = tpu.matmul %47, %51, %cst_37 {dimension_numbers = #tpu.dot_dimension_numbers<[1], [0], [0], [1], [0, 0, 1, 1], [], []>} : vector<1x64xf32>, vector<64x16xf32>, vector<1x16xf32> -> vector<1x16xf32>
    %cst_38 = arith.constant 3.125000e-02 : f32
    %53 = vector.broadcast %cst_38 : f32 to vector<1x16xf32>
    %54 = arith.mulf %52, %53 : vector<1x16xf32>
    %c0_39 = arith.constant 0 : index
    %c0_40 = arith.constant 0 : index
    %55 = vector.load %arg3[%c0_39, %c0_40] : memref<64x16xf32, #tpu.memory_space<vmem>>, vector<64x16xf32>
    %cst_41 = arith.constant dense<0.000000e+00> : vector<1x16xf32>
    %56 = tpu.matmul %50, %55, %cst_41 {dimension_numbers = #tpu.dot_dimension_numbers<[1], [0], [0], [1], [0, 0, 1, 1], [], []>} : vector<1x64xf32>, vector<64x16xf32>, vector<1x16xf32> -> vector<1x16xf32>
    %cst_42 = arith.constant 3.125000e-02 : f32
    %57 = vector.broadcast %cst_42 : f32 to vector<1x16xf32>
    %58 = arith.mulf %56, %57 : vector<1x16xf32>
    %59 = arith.mulf %54, %54 : vector<1x16xf32>
    %60 = arith.subf %58, %59 : vector<1x16xf32>
    %c0_43 = arith.constant 0 : index
    %c0_44 = arith.constant 0 : index
    %61 = vector.load %arg4[%c0_43, %c0_44] : memref<1x16xf32, #tpu.memory_space<vmem>>, vector<1x16xf32>
    %cst_45 = arith.constant 9.99999974E-6 : f32
    %62 = vector.broadcast %cst_45 : f32 to vector<1x16xf32>
    %63 = arith.addf %60, %62 : vector<1x16xf32>
    %64 = math.rsqrt %63 : vector<1x16xf32>
    %65 = arith.mulf %61, %64 : vector<1x16xf32>
    %c0_46 = arith.constant 0 : index
    %c0_47 = arith.constant 0 : index
    %66 = vector.load %arg5[%c0_46, %c0_47] : memref<1x16xf32, #tpu.memory_space<vmem>>, vector<1x16xf32>
    %67 = arith.mulf %54, %65 : vector<1x16xf32>
    %68 = arith.subf %66, %67 : vector<1x16xf32>
    %69 = tpu.concatenate %65, %65, %65, %65 in 1 : vector<1x16xf32>, vector<1x16xf32>, vector<1x16xf32>, vector<1x16xf32> -> vector<1x64xf32>
    %70 = vector.broadcast %69 : vector<1x64xf32> to vector<8x64xf32>
    %71 = arith.mulf %45, %70 : vector<8x64xf32>
    %72 = tpu.concatenate %68, %68, %68, %68 in 1 : vector<1x16xf32>, vector<1x16xf32>, vector<1x16xf32>, vector<1x16xf32> -> vector<1x64xf32>
    %73 = vector.broadcast %72 : vector<1x64xf32> to vector<8x64xf32>
    %74 = arith.addf %71, %73 : vector<8x64xf32>
    %cst_48 = arith.constant 0.000000e+00 : f32
    %75 = vector.broadcast %cst_48 : f32 to vector<8x64xf32>
    %76 = arith.cmpf oge, %74, %75 : vector<8x64xf32>
    %cst_49 = arith.constant 2.000000e-01 : f32
    %77 = vector.broadcast %cst_49 : f32 to vector<8x64xf32>
    %78 = arith.mulf %77, %74 : vector<8x64xf32>
    %79 = arith.select %76, %74, %78 : vector<8x64xi1>, vector<8x64xf32>
    %c8_50 = arith.constant 8 : index
    %c0_51 = arith.constant 0 : index
    %80 = vector.load %arg9[%c8_50, %c0_51] : memref<24x64xf32, #tpu.memory_space<vmem>>, vector<8x64xf32>
    tpu.vector_store %arg9[%c8_50, %c0_51], %79 {strides = array<i32>} : memref<24x64xf32, #tpu.memory_space<vmem>>, vector<8x64xf32>,
    %c8_52 = arith.constant 8 : index
    %c0_53 = arith.constant 0 : index
    %81 = tpu.strided_load %arg9[%c8_52, %c0_53] {strides = array<i32: 4, 1>} : memref<24x64xf32, #tpu.memory_space<vmem>>, vector<2x64xf32>
    %c9_54 = arith.constant 9 : index
    %c0_55 = arith.constant 0 : index
    %82 = tpu.strided_load %arg9[%c9_54, %c0_55] {strides = array<i32: 4, 1>} : memref<24x64xf32, #tpu.memory_space<vmem>>, vector<2x64xf32>
    %c10_56 = arith.constant 10 : index
    %c0_57 = arith.constant 0 : index
    %83 = tpu.strided_load %arg9[%c10_56, %c0_57] {strides = array<i32: 4, 1>} : memref<24x64xf32, #tpu.memory_space<vmem>>, vector<2x64xf32>
    %c11 = arith.constant 11 : index
    %c0_58 = arith.constant 0 : index
    %84 = tpu.strided_load %arg9[%c11, %c0_58] {strides = array<i32: 4, 1>} : memref<24x64xf32, #tpu.memory_space<vmem>>, vector<2x64xf32>
    %85 = tpu.concatenate %81, %82, %83, %84 in 1 : vector<2x64xf32>, vector<2x64xf32>, vector<2x64xf32>, vector<2x64xf32> -> vector<2x256xf32>
    %c0_59 = arith.constant 0 : index
    %c0_60 = arith.constant 0 : index
    %86 = vector.load %arg6[%c0_59, %c0_60] : memref<256x1xf32, #tpu.memory_space<vmem>>, vector<256x1xf32>
    %cst_61 = arith.constant dense<0.000000e+00> : vector<2x1xf32>
    %87 = tpu.matmul %85, %86, %cst_61 {dimension_numbers = #tpu.dot_dimension_numbers<[1], [0], [0], [1], [0, 0, 1, 1], [], []>} : vector<2x256xf32>, vector<256x1xf32>, vector<2x1xf32> -> vector<2x1xf32>
    %c0_62 = arith.constant 0 : index
    %c0_63 = arith.constant 0 : index
    %88 = vector.load %arg7[%c0_62, %c0_63] : memref<2x1xf32, #tpu.memory_space<vmem>>, vector<2x1xf32>
    tpu.vector_store %arg7[%c0_62, %c0_63], %87 {strides = array<i32>} : memref<2x1xf32, #tpu.memory_space<vmem>>, vector<2x1xf32>,
    return
  }
}

</mosaic_0001>

<bundles_post_ra>
// kernel: forward.1
= control target key start
LH: loop header
LB: loop body
LE: loop exit
PB: predicated region body
PF: predicated region fallthrough
CT: control target
= control target key end

     0   :  { %12 = vsyncpa [#allocation5], 0  ;;  %s1045_s24 = smov [#allocation4]   ;;  %s1427_s0 = inlined_call_operand.vmem [shape: f32[48,64], index: 0, kind: input, shape index: {}]   ;;  %s1428_s1 = inlined_call_operand.vmem [shape: f32[256,64], index: 1, kind: input, shape index: {}]   ;;  %s1429_s2 = inlined_call_operand.hbm [shape: f32[256,64], index: 2, kind: input, shape index: {}]   ;;  %s1430_s3 = inlined_call_operand.vmem [shape: f32[64,16], index: 3, kind: input, shape index: {}]   ;;  %s1431_s4 = inlined_call_operand.vmem [shape: f32[1,16], index: 4, kind: input, shape index: {}]   ;;  %s1432_s5 = inlined_call_operand.vmem [shape: f32[1,16], index: 5, kind: input, shape index: {}]   ;;  %s1433_s6 = inlined_call_operand.vmem [shape: f32[256,1], index: 6, kind: input, shape index: {}]   ;;  %s1434_s7 = inlined_call_operand.vmem [shape: f32[2,1], index: 7, kind: output, shape index: {}]  }
   0x1   :  { %s22_s25 = sshll.u32 %s1045_s24, 4  ;;  %s1021_s28 = scalar_lea.hbm %s1429_s2, 4096  ;;  %s23_s25 = int_to_ptr.vmem [resolvable:$true] %s22_s25 }
   0x2   :  { %p1022_p0 = scmp.ne.s32.totalorder %s1429_s2, %s1021_s28  ;;  %p1025_p1 = scmp.lt.u32.totalorder %s1021_s28, %s1429_s2 }
   0x4   :  { %p1027_p2 = pnand %p1025_p1, %p1022_p0 }
   0x6   :  { %1030 = shalt.err (!%p1027_p2)
}
   0x7   :  { %s1031_s10 = scalar_lea.vmem %s23_s25, 4096  ;;  %p1036_p4 = scmp.lt.s32.totalorder %s23_s25, %s23_s25 }
   0x8   :  { %p1032_p3 = scmp.ne.s32.totalorder %s23_s25, %s1031_s10  ;;  %p1037_p5 = scmp.lt.s32.totalorder %s1031_s10, %s1031_s10 }
   0xa   :  { %p1038_p6 = por %p1037_p5, %p1036_p4 }
   0xc   :  { %p1039_p7 = pnand %p1038_p6, %p1032_p3 }
   0xe   :  { %1042 = shalt.err (!%p1039_p7)
}
   0xf   :  { %s1046_s11 = smov 128   ;;  %s1047_s12 = smov 8  }
  0x10   :  { %28 = dma.hbm_to_vmem [thread:$0]  %s1429_s2, 4096, %s23_s25, [#allocation5], %s1046_s11, %s1046_s11, %s1047_s12  }
  0x11   :  { %1043 = dma.done.wait [#allocation5], 4096  }
  0x12   :  { %1044 = vsyncadd [#allocation5], 4294963200  ;;  %v64_v0 = vlaneseq  ;;  %v697_v5 = vld [vmem:[%s1427_s0 + $0x8] ss:$2 sm:$0xff]  ;;  %v698_v7 = vld [vmem:[%s1427_s0 + $0x18] ss:$2 sm:$0xff] }
  0x13   :  { %v701_v6 = vld [vmem:[%s1427_s0 + $0xa] ss:$2 sm:$0xff]  ;;  %v702_v9 = vld [vmem:[%s1427_s0 + $0x1a] ss:$2 sm:$0xff]  ;;  %s1048_s15 = smov 64   ;;  %vm40_vm3 = vcmask 523264  }
  0x14   :  { %v1107_v1 = vshrl.u32 %v64_v0, 7  ;;  %v113_v10 = vld [vmem:[%s1428_s1 + $0x80] sm:$0xff]  ;;  %v114_v11 = vld [vmem:[%s1428_s1 + $0x88] sm:$0xff]  ;;  %v115_v17 = vld [vmem:[%s1428_s1 + $0x90] sm:$0xff]  ;;  %vm1051_vm9 = vmmov 0   ;;  %s1052_s19 = smov 32  }
  0x15   :  { %v869_v14 = vpack.c.bf16 %v114_v11, %v113_v10  ;;  %v97_v15 = vld [vmem:[%s1428_s1] sm:$0xff]  ;;  %v98_v16 = vld [vmem:[%s1428_s1 + $0x8] sm:$0xff]  ;;  %v116_v19 = vld [vmem:[%s1428_s1 + $0x98] sm:$0xff]  ;;  %s1053_s20 = smov 16   ;;  %vm531_vm10 = vcmask 130048   ;;  %vm533_vm11 = vcmask 261120  }
  0x16   :  { %v67_v2 = vand.u32 7, %v1107_v1  ;;  %v1111_v3 = vadd.s32 8, %v1107_v1  ;;  %v871_v18 = vpack.c.bf16 %v98_v16, %v97_v15  ;;  %v99_v20 = vld [vmem:[%s1428_s1 + $0x10] sm:$0xff]  ;;  %v100_v21 = vld [vmem:[%s1428_s1 + $0x18] sm:$0xff]  ;;  %v873_v23 = vpack.c.bf16 %v116_v19, %v115_v17  ;;  %v117_v24 = vld [vmem:[%s1428_s1 + $0xa0] sm:$0xff] }
  0x17   :  { %870 = vmatprep.subr.bf16.mxu0 %v869_v14  ;;  %v118_v25 = vld [vmem:[%s1428_s1 + $0xa8] sm:$0xff]  ;;  %v875_v26 = vpack.c.bf16 %v100_v21, %v99_v20  ;;  %v101_v28 = vld [vmem:[%s1428_s1 + $0x20] sm:$0xff]  ;;  %v119_v30 = vld [vmem:[%s1428_s1 + $0xb0] sm:$0xff]  ;;  %vm535_vm12 = vcmask 392192   ;;  %vm688_vm14 = vcmask 1024  }
  0x18   :  { %vm73_vm0 = vcmp.eq.s32.totalorder %v67_v2, 7  ;;  %v68_v4 = vand.u32 7, %v1111_v3  ;;  %872 = vmatpush3.bf16.msra.mxu0 %v871_v18  ;;  %v877_v27 = vpack.c.bf16 %v118_v25, %v117_v24  ;;  %v102_v29 = vld [vmem:[%s1428_s1 + $0x28] sm:$0xff]  ;;  %v120_v31 = vld [vmem:[%s1428_s1 + $0xb8] sm:$0xff]  ;;  %v103_v34 = vld [vmem:[%s1428_s1 + $0x30] sm:$0xff]  ;;  %vm69_vm2 = vcmp.eq.s32.totalorder %v67_v2, 0 }
  0x19   :  { %v75_v8 = vsel %vm73_vm0, 0.0, %v701_v6  ;;  %874 = vmatprep.subr.bf16.mxu0 %v873_v23  ;;  %v879_v32 = vpack.c.bf16 %v102_v29, %v101_v28  ;;  %v881_v33 = vpack.c.bf16 %v120_v31, %v119_v30  ;;  %v104_v35 = vld [vmem:[%s1428_s1 + $0x38] sm:$0xff]  ;;  %v121_v36 = vld [vmem:[%s1428_s1 + $0xc0] sm:$0xff]  ;;  %v122_v37 = vld [vmem:[%s1428_s1 + $0xc8] sm:$0xff]  ;;  %v1049_v3 = vmov 0.0  }
  0x1a   :  { %vm74_vm1 = vcmp.eq.s32.totalorder %v68_v4, 7  ;;  %v999_v12 = vpack.i.bf16 %v697_v5, %v75_v8  ;;  %v883_v38 = vpack.c.bf16 %v104_v35, %v103_v34  ;;  %v885_v39 = vpack.c.bf16 %v122_v37, %v121_v36  ;;  %v105_v40 = vld [vmem:[%s1428_s1 + $0x40] sm:$0xff]  ;;  %v106_v41 = vld [vmem:[%s1428_s1 + $0x48] sm:$0xff]  ;;  %v123_v42 = vld [vmem:[%s1428_s1 + $0xd0] sm:$0xff]  ;;  %42 = vst.msk [vmem:[#allocation2 + $0x8] sm:$0xff] %vm40_vm3, %v1049_v3 }
  0x1b   :  { %v76_v13 = vsel %vm74_vm1, 0.0, %v702_v9  ;;  %v124_v43 = vld [vmem:[%s1428_s1 + $0xd8] sm:$0xff]  ;;  %v887_v44 = vpack.c.bf16 %v106_v41, %v105_v40  ;;  %v107_v46 = vld [vmem:[%s1428_s1 + $0x50] sm:$0xff]  ;;  %v125_v48 = vld [vmem:[%s1428_s1 + $0xe0] sm:$0xff]  ;;  %vm70_vm4 = vcmp.eq.s32.totalorder %v68_v4, 0  ;;  %41 = vst.msk [vmem:[#allocation2] sm:$0xff] %vm40_vm3, %v1049_v3 }
  0x1c   :  { %1000 = vrot.lane.b32.xlu0 %v999_v12, %s1048_s15  ;;  %v1004_v22 = vpack.i.bf16 %v698_v7, %v76_v13  ;;  %876 = vmatpush3.bf16.msra.mxu0 %v875_v26  ;;  %v889_v45 = vpack.c.bf16 %v124_v43, %v123_v42  ;;  %v108_v47 = vld [vmem:[%s1428_s1 + $0x58] sm:$0xff]  ;;  %v126_v49 = vld [vmem:[%s1428_s1 + $0xe8] sm:$0xff]  ;;  %v109_v52 = vld [vmem:[%s1428_s1 + $0x60] sm:$0xff]  ;;  %43 = vst.msk [vmem:[#allocation2 + $0x10] sm:$0xff] %vm40_vm3, %v1049_v3 }
  0x1d   :  { %878 = vmatprep.subr.bf16.mxu0 %v877_v27  ;;  %v891_v50 = vpack.c.bf16 %v108_v47, %v107_v46  ;;  %v893_v51 = vpack.c.bf16 %v126_v49, %v125_v48  ;;  %v110_v53 = vld [vmem:[%s1428_s1 + $0x68] sm:$0xff]  ;;  %v127_v54 = vld [vmem:[%s1428_s1 + $0xf0] sm:$0xff]  ;;  %v128_v55 = vld [vmem:[%s1428_s1 + $0xf8] sm:$0xff]  ;;  %44 = vst.msk [vmem:[#allocation2 + $0x18] sm:$0xff] %vm40_vm3, %v1049_v3 }
  0x1e   :  { %v895_v56 = vpack.c.bf16 %v110_v53, %v109_v52  ;;  %v897_v57 = vpack.c.bf16 %v128_v55, %v127_v54  ;;  %v111_v58 = vld [vmem:[%s1428_s1 + $0x70] sm:$0xff]  ;;  %v112_v59 = vld [vmem:[%s1428_s1 + $0x78] sm:$0xff]  ;;  %46 = vst.msk [vmem:[#allocation3 + $0x8] sm:$0xff] %vm40_vm3, %v1049_v3  ;;  %v252_v16 = vld [vmem:[#allocation4 + $0x88] sm:$0xff] }
  0x1f   :  { %v899_v60 = vpack.c.bf16 %v112_v59, %v111_v58  ;;  %v695_v61 = vld [vmem:[%s1427_s0 + $0x7] ss:$2 sm:$0xff]  ;;  %v696_v7 = vld [vmem:[%s1427_s0 + $0x17] ss:$2 sm:$0xff] }
  0x20   :  { %1005 = vrot.lane.b32.xlu0 %v1004_v22, %s1048_s15  ;;  %880 = vmatpush3.bf16.msra.mxu0 %v879_v32  ;;  %v699_v63 = vld [vmem:[%s1427_s0 + $0x9] ss:$2 sm:$0xff]  ;;  %v71_v0 = vsel %vm69_vm2, 0.0, %v695_v61  ;;  %v700_v10 = vld [vmem:[%s1427_s0 + $0x19] ss:$2 sm:$0xff]  ;;  %v72_v11 = vsel %vm70_vm4, 0.0, %v696_v7 }
  0x21   :  { %882 = vmatprep.subr.bf16.mxu0 %v881_v33  ;;  %v251_v4 = vld [vmem:[#allocation4 + $0x80] sm:$0xff]  ;;  %v236_v19 = vld [vmem:[#allocation4 + $0x8] sm:$0xff]  ;;  %v253_v20 = vld [vmem:[#allocation4 + $0x90] sm:$0xff] }
  0x22   :  { %v235_v17 = vld [vmem:[#allocation4] sm:$0xff]  ;;  %v901_v18 = vpack.c.bf16 %v252_v16, %v251_v4  ;;  %v254_v21 = vld [vmem:[#allocation4 + $0x98] sm:$0xff]  ;;  %v237_v24 = vld [vmem:[#allocation4 + $0x10] sm:$0xff] }
  0x23   :  { %v903_v22 = vpack.c.bf16 %v236_v19, %v235_v17  ;;  %v905_v23 = vpack.c.bf16 %v254_v21, %v253_v20  ;;  %v238_v25 = vld [vmem:[#allocation4 + $0x18] sm:$0xff]  ;;  %v255_v26 = vld [vmem:[#allocation4 + $0xa0] sm:$0xff]  ;;  %v256_v27 = vld [vmem:[#allocation4 + $0xa8] sm:$0xff] }
  0x24   :  { %884 = vmatpush3.bf16.msra.mxu0 %v883_v38  ;;  %902 = vmatprep.subr.bf16.mxu1 %v901_v18  ;;  %v907_v28 = vpack.c.bf16 %v238_v25, %v237_v24  ;;  %v909_v29 = vpack.c.bf16 %v256_v27, %v255_v26  ;;  %v239_v30 = vld [vmem:[#allocation4 + $0x20] sm:$0xff]  ;;  %v240_v31 = vld [vmem:[#allocation4 + $0x28] sm:$0xff]  ;;  %v257_v32 = vld [vmem:[#allocation4 + $0xb0] sm:$0xff]  ;;  %v1050_v27 = vmov 0.0|0.0  }
  0x25   :  { %886 = vmatprep.subr.bf16.mxu0 %v885_v39  ;;  %904 = vmatpush3.bf16.msra.mxu1 %v903_v22  ;;  %v258_v33 = vld [vmem:[#allocation4 + $0xb8] sm:$0xff]  ;;  %v911_v34 = vpack.c.bf16 %v240_v31, %v239_v30  ;;  %v241_v36 = vld [vmem:[#allocation4 + $0x30] sm:$0xff]  ;;  %v259_v38 = vld [vmem:[#allocation4 + $0xc0] sm:$0xff] }
  0x26   :  { %906 = vmatprep.subr.bf16.mxu1 %v905_v23  ;;  %v913_v35 = vpack.c.bf16 %v258_v33, %v257_v32  ;;  %v242_v37 = vld [vmem:[#allocation4 + $0x38] sm:$0xff]  ;;  %v260_v39 = vld [vmem:[#allocation4 + $0xc8] sm:$0xff]  ;;  %v243_v42 = vld [vmem:[#allocation4 + $0x40] sm:$0xff] }
  0x27   :  { %v915_v40 = vpack.c.bf16 %v242_v37, %v241_v36  ;;  %v917_v41 = vpack.c.bf16 %v260_v39, %v259_v38  ;;  %v244_v43 = vld [vmem:[#allocation4 + $0x48] sm:$0xff]  ;;  %v245_v48 = vld [vmem:[#allocation4 + $0x50] sm:$0xff]  ;;  %v246_v49 = vld [vmem:[#allocation4 + $0x58] sm:$0xff] }
  0x28   :  { %888 = vmatpush3.bf16.msra.mxu0 %v887_v44  ;;  %v261_v44 = vld [vmem:[#allocation4 + $0xd0] sm:$0xff]  ;;  %v919_v46 = vpack.c.bf16 %v244_v43, %v243_v42  ;;  %v923_v52 = vpack.c.bf16 %v246_v49, %v245_v48  ;;  %v247_v54 = vld [vmem:[#allocation4 + $0x60] sm:$0xff]  ;;  %v248_v55 = vld [vmem:[#allocation4 + $0x68] sm:$0xff] }
  0x29   :  { %890 = vmatprep.subr.bf16.mxu0 %v889_v45  ;;  %908 = vmatpush3.bf16.msra.mxu1 %v907_v28  ;;  %v262_v45 = vld [vmem:[#allocation4 + $0xd8] sm:$0xff]  ;;  %v352_v24 = vld [vmem:[%s1430_s3] sm:$0xff]  ;;  %v353_v25 = vld [vmem:[%s1430_s3 + $0x8] sm:$0xff] }
  0x2a   :  { %910 = vmatprep.subr.bf16.mxu1 %v909_v29  ;;  %v921_v47 = vpack.c.bf16 %v262_v45, %v261_v44  ;;  %v934_v26 = vpack.c.bf16 %v353_v25, %v352_v24  ;;  %v354_v28 = vld [vmem:[%s1430_s3 + $0x10] sm:$0xff]  ;;  %v355_v29 = vld [vmem:[%s1430_s3 + $0x18] sm:$0xff]  ;;  %v356_v31 = vld [vmem:[%s1430_s3 + $0x20] sm:$0xff] }
  0x2b   :  { %v937_v30 = vpack.c.bf16 %v355_v29, %v354_v28  ;;  %v357_v32 = vld [vmem:[%s1430_s3 + $0x28] sm:$0xff]  ;;  %v590_v24 = vld [vmem:[%s1433_s6 + $0x20] sm:$0xff] }
  0x2c   :  { %892 = vmatpush3.bf16.msra.mxu0 %v891_v50  ;;  %v263_v50 = vld [vmem:[#allocation4 + $0xe0] sm:$0xff]  ;;  %v940_v33 = vpack.c.bf16 %v357_v32, %v356_v31  ;;  %v591_v25 = vld [vmem:[%s1433_s6 + $0x28] sm:$0xff]  ;;  %v610_v32 = vld [vmem:[%s1433_s6 + $0xc0] sm:$0xff] }
  0x2d   :  { %894 = vmatprep.subr.bf16.mxu0 %v893_v51  ;;  %912 = vmatpush3.bf16.msra.mxu1 %v911_v34  ;;  %v264_v51 = vld [vmem:[#allocation4 + $0xe8] sm:$0xff]  ;;  %v358_v34 = vld [vmem:[%s1430_s3 + $0x30] sm:$0xff]  ;;  %v967_v28 = vpack.c.bf16 %v591_v25, %v590_v24  ;;  %v593_v31 = vld [vmem:[%s1433_s6 + $0x38] sm:$0xff] }
  0x2e   :  { %914 = vmatprep.subr.bf16.mxu1 %v913_v35  ;;  %v925_v53 = vpack.c.bf16 %v264_v51, %v263_v50  ;;  %v359_v35 = vld [vmem:[%s1430_s3 + $0x38] sm:$0xff] }
  0x2f   :  { %v943_v36 = vpack.c.bf16 %v359_v35, %v358_v34 }
  0x30   :  { %896 = vmatpush3.bf16.msra.mxu0 %v895_v56  ;;  %v927_v56 = vpack.c.bf16 %v248_v55, %v247_v54 }
  0x31   :  { %898 = vmatprep.subr.bf16.mxu0 %v897_v57  ;;  %916 = vmatpush3.bf16.msra.mxu1 %v915_v40 }
  0x32   :  { %918 = vmatprep.subr.bf16.mxu1 %v917_v41 }
  0x34   :  { %900 = vmatpush3.bf16.msra.mxu0 %v899_v60 }
  0x35   :  { %920 = vmatpush3.bf16.msra.mxu1 %v919_v46 }
  0x36   :  { %922 = vmatprep.subr.bf16.mxu1 %v921_v47 }
  0x39   :  { %924 = vmatpush3.bf16.msra.mxu1 %v923_v52 }
  0x3a   :  { %926 = vmatprep.subr.bf16.mxu1 %v925_v53 }
  0x3d   :  { %928 = vmatpush3.bf16.msra.mxu1 %v927_v56 }
  0x8e   :  { %v1001_v62 = vpop.permute.xlu0 %1000 }
  0x8f   :  { %v1003_v5 = vunpack.i.h.bf16 %v1001_v62  ;;  %v1002_v6 = vunpack.i.l.bf16 %v1001_v62 }
  0x91   :  { %v95_v8 = vsel %vm40_vm3, %v699_v63, %v1002_v6  ;;  %v93_v2 = vsel %vm40_vm3, %v71_v0, %v1003_v5  ;;  %v265_v5 = vld [vmem:[#allocation4 + $0xf0] sm:$0xff]  ;;  %v266_v6 = vld [vmem:[#allocation4 + $0xf8] sm:$0xff] }
  0x92   :  { %v1006_v9 = vpop.permute.xlu0 %1005  ;;  %193 = vmatprep.mubr.f32.mxu0 %v95_v8  ;;  %v929_v7 = vpack.c.bf16 %v266_v6, %v265_v5  ;;  %v249_v8 = vld [vmem:[#allocation4 + $0x70] sm:$0xff] }
  0x93   :  { %v1008_v12 = vunpack.i.h.bf16 %v1006_v9  ;;  %v1007_v13 = vunpack.i.l.bf16 %v1006_v9  ;;  %194 = vmatmul.mubr.f32.vlgmr.msra.gmra.mrb[0].mxu0 %v93_v2  ;;  %v250_v2 = vld [vmem:[#allocation4 + $0x78] sm:$0xff] }
  0x94   :  { %930 = vmatprep.subr.bf16.mxu1 %v929_v7  ;;  %v514_v7 = vld [vmem:[%s1432_s5] sm:$0x1] }
  0x95   :  { %v96_v14 = vsel %vm40_vm3, %v700_v10, %v1007_v13  ;;  %v94_v15 = vsel %vm40_vm3, %v72_v11, %v1008_v12  ;;  %v931_v10 = vpack.c.bf16 %v250_v2, %v249_v8  ;;  %v220_v12 = vand.u32 3, %v1107_v1 }
  0x96   :  { %198 = vmatprep.mubr.f32.mxu0 %v96_v14 }
  0x97   :  { %199 = vmatmul.mubr.f32.gmra.mrb[2].mxu0 %v94_v15  ;;  %932 = vmatpush3.bf16.msra.mxu1 %v931_v10  ;;  %vm223_vm7 = vcmp.eq.s32.totalorder %v220_v12, 3  ;;  %vm221_vm8 = vcmp.eq.s32.totalorder %v220_v12, 0  ;;  %v602_v10 = vld [vmem:[%s1433_s6 + $0x80] sm:$0xff] }
  0x98   :  { %933 = vmatprep.subr.bf16.mxu1 %v1050_v27  ;;  %v586_v12 = vld [vmem:[%s1433_s6] sm:$0xff] }
 0x166   :  { %v737_v57 = vpop.f32.mrb[0].mxu0 }
 0x167   :  { %v738_v58 = vpop.f32.mrb[1].mxu0 }
 0x168   :  { %v739_v59 = vadd.f32 %v738_v58, %v737_v57 }
 0x16a   :  { %vm204_vm5 = vcmp.ge.f32.partialorder %v739_v59, 0.0  ;;  %v206_v60 = vmul.f32 0.2, %v739_v59  ;;  %v740_v61 = vpop.f32.mrb[2].mxu0 }
 0x16b   :  { %v741_v62 = vpop.f32.mrb[3].mxu0 }
 0x16c   :  { %v208_v63 = vsel %vm204_vm5, %v739_v59, %v206_v60  ;;  %v742_v0 = vadd.f32 %v741_v62, %v740_v61 }
 0x16d   :  { %210 = vst.msk [vmem:[#allocation2 + $0x8] sm:$0xff] %vm40_vm3, %v208_v63  ;;  %v510_v63 = vld [vmem:[%s1431_s4] sm:$0x1]  ;;  %s1054_s4 = smov 48  }
 0x16e   :  { %vm205_vm6 = vcmp.ge.f32.partialorder %v742_v0, 0.0  ;;  %v207_v9 = vmul.f32 0.2, %v742_v0 }
 0x170   :  { %v209_v11 = vsel %vm205_vm6, %v742_v0, %v207_v9  ;;  %v1305_v0 = vsub.s32 0, %v1107_v1 }
 0x171   :  { %211 = vst.msk [vmem:[#allocation2 + $0x10] sm:$0xff] %vm40_vm3, %v209_v11  ;;  %v603_v11 = vld [vmem:[%s1433_s6 + $0x88] sm:$0xff] }
 0x178   :  { %v215_v13 = vld [vmem:[#allocation2 + $0x8] ss:$2 sm:$0xff]  ;;  %v213_v16 = vld [vmem:[#allocation2 + $0x7] ss:$2 sm:$0xff] }
 0x179   :  { %v219_v14 = vld [vmem:[#allocation2 + $0xa] ss:$2 sm:$0xff]  ;;  %v217_v20 = vld [vmem:[#allocation2 + $0x9] ss:$2 sm:$0xff]  ;;  %v222_v21 = vsel %vm221_vm8, 0.0, %v213_v16 }
 0x17a   :  { %v224_v15 = vsel %vm223_vm7, 0.0, %v219_v14  ;;  %v587_v14 = vld [vmem:[%s1433_s6 + $0x8] sm:$0xff] }
 0x17b   :  { %v1009_v4 = vpack.i.bf16 %v215_v13, %v224_v15  ;;  %v957_v13 = vpack.c.bf16 %v603_v11, %v602_v10  ;;  %v604_v15 = vld [vmem:[%s1433_s6 + $0x90] sm:$0xff]  ;;  %v959_v16 = vpack.c.bf16 %v587_v14, %v586_v12 }
 0x17d   :  { %1010 = vrot.lane.b32.xlu1 %v1009_v4, %s1048_s15  ;;  %v605_v4 = vld [vmem:[%s1433_s6 + $0x98] sm:$0xff]  ;;  %958 = vmatprep.subr.bf16.mxu0 %v957_v13 }
 0x17e   :  { %960 = vmatpush3.bf16.msra.mxu0 %v959_v16 }
 0x1ef   :  { %v1011_v17 = vpop.permute.xlu1 %1010 }
 0x1f0   :  { %v1013_v18 = vunpack.i.h.bf16 %v1011_v17  ;;  %v1012_v19 = vunpack.i.l.bf16 %v1011_v17  ;;  %v961_v17 = vpack.c.bf16 %v605_v4, %v604_v15 }
 0x1f2   :  { %v234_v22 = vsel %vm40_vm3, %v217_v20, %v1012_v19  ;;  %v233_v23 = vsel %vm40_vm3, %v222_v21, %v1013_v18  ;;  %v588_v18 = vld [vmem:[%s1433_s6 + $0x10] sm:$0xff]  ;;  %v589_v19 = vld [vmem:[%s1433_s6 + $0x18] sm:$0xff]  ;;  %v606_v20 = vld [vmem:[%s1433_s6 + $0xa0] sm:$0xff]  ;;  %962 = vmatprep.subr.bf16.mxu0 %v961_v17 }
 0x1f3   :  { %331 = vmatprep.mubr.f32.mxu1 %v234_v22  ;;  %v607_v21 = vld [vmem:[%s1433_s6 + $0xa8] sm:$0xff]  ;;  %v963_v22 = vpack.c.bf16 %v589_v19, %v588_v18 }
 0x1f4   :  { %332 = vmatmul.mubr.f32.vlgmr.msra.gmra.mrb[0].mxu1 %v233_v23  ;;  %v965_v23 = vpack.c.bf16 %v607_v21, %v606_v20 }
 0x1f5   :  { %935 = vmatpush3.bf16.msra.mxu1 %v934_v26  ;;  %847 = vmatprep.mubr.msk.f32.mxu1 %vm1051_vm9, %v1049_v3 }
 0x1f6   :  { %936 = vmatprep.subr.bf16.mxu1 %v1050_v27  ;;  %964 = vmatpush3.bf16.msra.mxu0 %v963_v22 }
 0x1f7   :  { %966 = vmatprep.subr.bf16.mxu0 %v965_v23 }
 0x1f9   :  { %938 = vmatpush3.bf16.msra.mxu1 %v937_v30 }
 0x1fa   :  { %939 = vmatprep.subr.bf16.mxu1 %v1050_v27  ;;  %968 = vmatpush3.bf16.msra.mxu0 %v967_v28 }
 0x1fd   :  { %941 = vmatpush3.bf16.msra.mxu1 %v940_v33 }
 0x1fe   :  { %942 = vmatprep.subr.bf16.mxu1 %v1050_v27 }
 0x201   :  { %944 = vmatpush3.bf16.msra.mxu1 %v943_v36 }
 0x202   :  { %945 = vmatprep.subr.bf16.mxu1 %v1050_v27 }
 0x2c7   :  { %v775_v37 = vpop.f32.mrb[0].mxu1 }
 0x2c8   :  { %v776_v38 = vpop.f32.mrb[1].mxu1 }
 0x2c9   :  { %v1290_v39 = vadd.f32 %v776_v38, %v775_v37  ;;  %v595_v37 = vld [vmem:[%s1433_s6 + $0x48] sm:$0xff]  ;;  %v612_v38 = vld [vmem:[%s1433_s6 + $0xd0] sm:$0xff] }
 0x2cb   :  { %v337_v40 = vsel %vm40_vm3, %v1290_v39, 0.0  ;;  %v344_v41 = vmul.f32 %v1290_v39, %v1290_v39 }
 0x2cc   :  { %v338_v42 = vrot.slane %v337_v40, 4 }
 0x2cd   :  { %v345_v44 = vsel %vm40_vm3, %v344_v41, 0.0 }
 0x2ce   :  { %v339_v43 = vadd.f32 %v338_v42, %v337_v40  ;;  %v346_v47 = vrot.slane %v345_v44, 4  ;;  %v613_v40 = vld [vmem:[%s1433_s6 + $0xd8] sm:$0xff] }
 0x2cf   :  { %v977_v42 = vpack.c.bf16 %v613_v40, %v612_v38 }
 0x2d0   :  { %v340_v45 = vrot.slane %v339_v43, 2  ;;  %v347_v50 = vadd.f32 %v346_v47, %v345_v44  ;;  %v597_v44 = vld [vmem:[%s1433_s6 + $0x58] sm:$0xff] }
 0x2d2   :  { %v341_v46 = vadd.f32 %v340_v45, %v339_v43  ;;  %v348_v51 = vrot.slane %v347_v50, 2  ;;  %v596_v43 = vld [vmem:[%s1433_s6 + $0x50] sm:$0xff]  ;;  %v614_v45 = vld [vmem:[%s1433_s6 + $0xe0] sm:$0xff] }
 0x2d3   :  { %v979_v47 = vpack.c.bf16 %v597_v44, %v596_v43 }
 0x2d4   :  { %v342_v48 = vrot.slane %v341_v46, 1  ;;  %v349_v52 = vadd.f32 %v348_v51, %v347_v50  ;;  %v599_v50 = vld [vmem:[%s1433_s6 + $0x68] sm:$0xff] }
 0x2d6   :  { %v343_v49 = vadd.f32 %v342_v48, %v341_v46  ;;  %v350_v53 = vrot.slane %v349_v52, 1  ;;  %v615_v46 = vld [vmem:[%s1433_s6 + $0xe8] sm:$0xff] }
 0x2d7   :  { %v981_v48 = vpack.c.bf16 %v615_v46, %v614_v45 }
 0x2d8   :  { %848 = vmatmul.mubr.msk.f32.vlgmr.msra.gmra.mrb[2].mxu1 %vm40_vm3, %v343_v49  ;;  %v351_v54 = vadd.f32 %v350_v53, %v349_v52  ;;  %v598_v49 = vld [vmem:[%s1433_s6 + $0x60] sm:$0xff] }
 0x2d9   :  { %947 = vmatpush3.bf16.msra.mxu1 %v934_v26  ;;  %866 = vmatprep.mubr.msk.f32.mxu1 %vm1051_vm9, %v1049_v3  ;;  %v608_v26 = vld [vmem:[%s1433_s6 + $0xb0] sm:$0xff]  ;;  %v983_v51 = vpack.c.bf16 %v599_v50, %v598_v49 }
 0x2da   :  { %948 = vmatprep.subr.bf16.mxu1 %v1050_v27 }
 0x2dd   :  { %950 = vmatpush3.bf16.msra.mxu1 %v937_v30  ;;  %v592_v30 = vld [vmem:[%s1433_s6 + $0x30] sm:$0xff] }
 0x2de   :  { %951 = vmatprep.subr.bf16.mxu1 %v1050_v27  ;;  %v971_v34 = vpack.c.bf16 %v593_v31, %v592_v30 }
 0x2e1   :  { %953 = vmatpush3.bf16.msra.mxu1 %v940_v33  ;;  %v611_v33 = vld [vmem:[%s1433_s6 + $0xc8] sm:$0xff] }
 0x2e2   :  { %954 = vmatprep.subr.bf16.mxu1 %v1050_v27  ;;  %v609_v27 = vld [vmem:[%s1433_s6 + $0xb8] sm:$0xff]  ;;  %v973_v35 = vpack.c.bf16 %v611_v33, %v610_v32 }
 0x2e3   :  { %v969_v29 = vpack.c.bf16 %v609_v27, %v608_v26 }
 0x2e5   :  { %956 = vmatpush3.bf16.msra.mxu1 %v943_v36  ;;  %970 = vmatprep.subr.bf16.mxu0 %v969_v29  ;;  %v594_v36 = vld [vmem:[%s1433_s6 + $0x40] sm:$0xff] }
 0x2e6   :  { %972 = vmatpush3.bf16.msra.mxu0 %v971_v34  ;;  %v975_v41 = vpack.c.bf16 %v595_v37, %v594_v36 }
 0x2e7   :  { %974 = vmatprep.subr.bf16.mxu0 %v973_v35 }
 0x2e8   :  { %867 = vmatmul.mubr.msk.f32.vlgmr.msra.gmra.mrb[4].mxu1 %vm40_vm3, %v351_v54 }
 0x2ea   :  { %976 = vmatpush3.bf16.msra.mxu0 %v975_v41 }
 0x2eb   :  { %978 = vmatprep.subr.bf16.mxu0 %v977_v42 }
 0x2ee   :  { %980 = vmatpush3.bf16.msra.mxu0 %v979_v47 }
 0x2ef   :  { %982 = vmatprep.subr.bf16.mxu0 %v981_v48 }
 0x2f2   :  { %984 = vmatpush3.bf16.msra.mxu0 %v983_v51 }
 0x3ab   :  { %v429_v55 = vpop.f32.mrb[2].mxu1 }
 0x3ac   :  { %v849_v56 = vpop.f32.mrb[3].mxu1  ;;  %v433_v57 = vmul.f32 0.03125, %v429_v55 }
 0x3ae   :  { %v508_v59 = vmul.f32 %v433_v57, %v433_v57 }
 0x3bb   :  { %v503_v58 = vpop.f32.mrb[4].mxu1 }
 0x3bc   :  { %v507_v60 = vmul.f32 0.03125, %v503_v58  ;;  %v868_v61 = vpop.f32.mrb[5].mxu1 }
 0x3be   :  { %v509_v3 = vsub.f32 %v507_v60, %v508_v59 }
 0x3c0   :  { %v511_v62 = vadd.f32 1e-05, %v509_v3 }
 0x3c2   :  { %1019 = vrsqrt.f32 %v511_v62 }
 0x3cc   :  { %v1020_v5 = vpop.eup %1019 }
 0x3cd   :  { %v1307_v6 = vmul.f32 %v1020_v5, %v510_v63 }
 0x3cf   :  { %v521_v8 = vrot.slane %v1307_v6, %v1305_v0  ;;  %v515_v2 = vmul.f32 %v1307_v6, %v433_v57 }
 0x3d1   :  { %525 = vrot.lane.b32.xlu0 %v521_v8, %s1052_s19  ;;  %522 = vrot.lane.b32.xlu1 %v521_v8, %s1053_s20  ;;  %v1315_v9 = vsub.f32 %v514_v7, %v515_v2  ;;  %v617_v2 = vld [vmem:[%s1433_s6 + $0xf8] sm:$0xff] }
 0x3d3   :  { %v546_v1 = vrot.slane %v1315_v9, %v1305_v0 }
 0x3d5   :  { %528 = vrot.lane.b32.xlu1 %v521_v8, %s1054_s4  ;;  %547 = vrot.lane.b32.xlu0 %v546_v1, %s1053_s20 }
 0x3d9   :  { %550 = vrot.lane.b32.xlu1 %v546_v1, %s1052_s19  ;;  %553 = vrot.lane.b32.xlu0 %v546_v1, %s1054_s4 }
 0x443   :  { %v526_v52 = vpop.permute.xlu0 %525  ;;  %v523_v53 = vpop.permute.xlu1 %522 }
 0x444   :  { %v532_v54 = vsel %vm531_vm10, %v1307_v6, %v523_v53  ;;  %v616_v6 = vld [vmem:[%s1433_s6 + $0xf0] sm:$0xff] }
 0x445   :  { %v534_v55 = vsel %vm533_vm11, %v532_v54, %v526_v52  ;;  %v985_v1 = vpack.c.bf16 %v617_v2, %v616_v6 }
 0x447   :  { %v529_v56 = vpop.permute.xlu1 %528  ;;  %v548_v57 = vpop.permute.xlu0 %547  ;;  %986 = vmatprep.subr.bf16.mxu0 %v985_v1 }
 0x448   :  { %v536_v58 = vsel %vm535_vm12, %v534_v55, %v529_v56  ;;  %v556_v60 = vsel %vm531_vm10, %v1315_v9, %v548_v57  ;;  %v600_v9 = vld [vmem:[%s1433_s6 + $0x70] sm:$0xff] }
 0x449   :  { %v540_v59 = vrot.slane %v536_v58, %v1305_v0 }
 0x44b   :  { %v551_v61 = vpop.permute.xlu1 %550  ;;  %v554_v3 = vpop.permute.xlu0 %553  ;;  %v541_v5 = vmul.f32 %v1290_v39, %v540_v59  ;;  %v601_v39 = vld [vmem:[%s1433_s6 + $0x78] sm:$0xff] }
 0x44c   :  { %v557_v62 = vsel %vm533_vm11, %v556_v60, %v551_v61  ;;  %v987_v10 = vpack.c.bf16 %v601_v39, %v600_v9 }
 0x44d   :  { %v558_v63 = vsel %vm535_vm12, %v557_v62, %v554_v3 }
 0x44e   :  { %v562_v7 = vrot.slane %v558_v63, %v1305_v0  ;;  %988 = vmatpush3.bf16.msra.mxu0 %v987_v10 }
 0x450   :  { %v563_v8 = vadd.f32 %v562_v7, %v541_v5 }
 0x452   :  { %vm564_vm13 = vcmp.ge.f32.partialorder %v563_v8, 0.0  ;;  %v565_v0 = vmul.f32 0.2, %v563_v8 }
 0x454   :  { %v566_v11 = vsel %vm564_vm13, %v563_v8, %v565_v0 }
 0x455   :  { %567 = vst.msk [vmem:[#allocation3 + $0x8] sm:$0xff] %vm40_vm3, %v566_v11 }
 0x45c   :  { %v571_v12 = vld [vmem:[#allocation3 + $0x9] ss:$4 sm:$0x3]  ;;  %v575_v13 = vld [vmem:[#allocation3 + $0xb] ss:$4 sm:$0x3] }
 0x45d   :  { %v1014_v14 = vpack.i.bf16 %v571_v12, %v575_v13  ;;  %v569_v17 = vld [vmem:[#allocation3 + $0x8] ss:$4 sm:$0x3]  ;;  %v573_v18 = vld [vmem:[#allocation3 + $0xa] ss:$4 sm:$0x3] }
 0x45f   :  { %1015 = vrot.lane.b32.xlu1 %v1014_v14, %s1048_s15 }
 0x4d1   :  { %v1016_v15 = vpop.permute.xlu1 %1015 }
 0x4d2   :  { %v1018_v4 = vunpack.i.h.bf16 %v1016_v15  ;;  %v1017_v16 = vunpack.i.l.bf16 %v1016_v15 }
 0x4d4   :  { %v584_v19 = vsel %vm40_vm3, %v569_v17, %v1018_v4  ;;  %v585_v20 = vsel %vm40_vm3, %v573_v18, %v1017_v16 }
 0x4d5   :  { %682 = vmatprep.mubr.f32.mxu0 %v585_v20 }
 0x4d6   :  { %683 = vmatmul.mubr.f32.vlgmr.msra.gmra.mrb[4].mxu0 %v584_v19 }
 0x5a9   :  { %v828_v21 = vpop.f32.mrb[4].mxu0 }
 0x5aa   :  { %v829_v22 = vpop.f32.mrb[5].mxu0 }
 0x5ab   :  { %v830_v23 = vadd.f32 %v829_v22, %v828_v21 }
 0x5ad   :  { %689 = vst.msk [vmem:[%s1434_s7] sm:$0x3] %vm688_vm14, %v830_v23 }
 0x5ae   :  { %694 = vsyncpa [#allocation5], 1 }

</bundles_post_ra>
